<compile_context>
chip_gen: v6e
topology: v6e:2x2x1
jax: 0.10.0
libtpu: 0.0.40
codegen_flags: <defaults>
</compile_context>

<pallas_src>
import functools
import math

import jax
import jax.numpy as jnp
from jax import lax
from jax.experimental import pallas as pl
from jax.experimental.pallas import tpu as pltpu


# ---------------------------------------------------------------------------
# helpers
# ---------------------------------------------------------------------------

def _round_up(x: int, m: int) -> int:
    return (x + m - 1) // m * m


def _pick_tile(dim: int, candidates) -> int:
    for c in candidates:
        if dim % c == 0:
            return c
    return dim


def _vmem_limit(footprint_bytes: int) -> int:
    # Footprint-derived budget + margin for compiler-internal scratch.
    # Floor 16 MiB (<= every generation's scoped default), cap 48 MiB so the
    # same setting leaves headroom on v7x's 64 MiB physical VMEM.
    return int(min(48 << 20, max(16 << 20, footprint_bytes + (4 << 20))))


def _attn_block_target() -> int:
    """Attention tile size: 256 on 256-wide-MXU chips (v6e/v7x), else 128."""
    try:
        kind = jax.devices()[0].device_kind.lower()
    except Exception:  # pragma: no cover - defensive
        kind = ""
    if ("v6" in kind) or ("v7" in kind) or ("tpu7" in kind):
        return 256
    return 128


def _pad_heads_last(a, n_heads, hd, hd_p):
    """Zero-pad a head-major last axis (H*hd) to (H*hd_p), per head."""
    if hd_p == hd:
        return a
    lead = a.shape[:-1]
    a = a.reshape(lead + (n_heads, hd))
    pad = [(0, 0)] * (len(lead) + 1) + [(0, hd_p - hd)]
    return jnp.pad(a, pad).reshape(lead + (n_heads * hd_p,))


# ---------------------------------------------------------------------------
# tiled linear (x @ w_t + b) kernel -- qkv and output projections
# ---------------------------------------------------------------------------

def _linear_kernel(x_ref, w_ref, b_ref, o_ref, acc_ref):
    k = pl.program_id(2)

    @pl.when(k == 0)
    def _():
        acc_ref[...] = jnp.zeros(acc_ref.shape, acc_ref.dtype)

    acc_ref[...] += jnp.dot(x_ref[...], w_ref[...],
                            preferred_element_type=jnp.float32)

    @pl.when(k == pl.num_programs(2) - 1)
    def _():
        o_ref[...] = (acc_ref[...] + b_ref[...]).astype(o_ref.dtype)


def _linear(x2d, w_t, bias_row, out_dtype):
    """x2d: (M, K), w_t: (K, N) [pre-transposed], bias_row: (1, N) f32."""
    M, K = x2d.shape
    Kw, N = w_t.shape
    assert K == Kw and K % 128 == 0 and N % 128 == 0

    tk = _pick_tile(K, (512, 256, 128))
    tn = _pick_tile(N, (512, 256, 128))
    if M <= 256:
        Mp = _round_up(M, 8)
        tm = Mp
    else:
        tm = 256
        Mp = _round_up(M, tm)
    if Mp != M:
        x2d = jnp.pad(x2d, ((0, Mp - M), (0, 0)))

    in_bytes = jnp.dtype(x2d.dtype).itemsize
    out_bytes = jnp.dtype(out_dtype).itemsize
    vmem = (2 * (tm * tk + tk * tn) * in_bytes + 2 * tn * 4
            + 2 * tm * tn * out_bytes + tm * tn * 4)
    flops = 2 * Mp * K * N
    bytes_accessed = (Mp * K + K * N) * in_bytes + Mp * N * out_bytes

    out = pl.pallas_call(
        _linear_kernel,
        out_shape=jax.ShapeDtypeStruct((Mp, N), out_dtype),
        grid_spec=pltpu.PrefetchScalarGridSpec(
            num_scalar_prefetch=0,
            grid=(Mp // tm, N // tn, K // tk),
            in_specs=[
                pl.BlockSpec((tm, tk), lambda i, j, k: (i, k)),
                pl.BlockSpec((tk, tn), lambda i, j, k: (k, j)),
                pl.BlockSpec((1, tn), lambda i, j, k: (0, j)),
            ],
            out_specs=pl.BlockSpec((tm, tn), lambda i, j, k: (i, j)),
            scratch_shapes=[pltpu.VMEM((tm, tn), jnp.float32)],
        ),
        compiler_params=pltpu.CompilerParams(
            dimension_semantics=("parallel", "parallel", "arbitrary"),
            vmem_limit_bytes=_vmem_limit(vmem),
        ),
        cost_estimate=pl.CostEstimate(flops=int(flops), transcendentals=0,
                                      bytes_accessed=int(bytes_accessed)),
    )(x2d, w_t, bias_row)
    return out[:M] if Mp != M else out


# ---------------------------------------------------------------------------
# causal flash-attention kernel (online softmax, per-head lane slices of a
# lane-dense (block, Dp) tile; output written lane-dense as (block, Dp))
# ---------------------------------------------------------------------------

def _flash_attn_kernel(q_ref, k_ref, v_ref, o_ref, m_sc, l_sc, acc_sc,
                       *, n_heads, head_dim, block_q, block_k):
    qi = pl.program_id(1)
    ki = pl.program_id(2)

    @pl.when(ki == 0)
    def _():
        m_sc[...] = jnp.full(m_sc.shape, -jnp.inf, m_sc.dtype)
        l_sc[...] = jnp.zeros(l_sc.shape, l_sc.dtype)
        acc_sc[...] = jnp.zeros(acc_sc.shape, acc_sc.dtype)

    def update(masked):
        if masked:
            row = qi * block_q + lax.broadcasted_iota(
                jnp.int32, (block_q, block_k), 0)
            col = ki * block_k + lax.broadcasted_iota(
                jnp.int32, (block_q, block_k), 1)
            causal = row >= col
        for h in range(n_heads):
            sl = slice(h * head_dim, (h + 1) * head_dim)
            q = q_ref[:, sl]                    # (bq, hd)  compute dtype
            k = k_ref[:, sl]                    # (bk, hd)
            v = v_ref[:, sl]                    # (bk, hd)
            # scores; 1/sqrt(head_dim) is folded into the q projection weights
            s = lax.dot_general(q, k, (((1,), (1,)), ((), ())),
                                preferred_element_type=jnp.float32)
            if masked:
                s = jnp.where(causal, s, -1e30)
            m_prev = m_sc[h]                                        # (bq, 1)
            m_new = jnp.maximum(m_prev, s.max(axis=-1, keepdims=True))
            alpha = jnp.exp(m_prev - m_new)
            p = jnp.exp(s - m_new)                                  # (bq, bk)
            l_sc[h] = alpha * l_sc[h] + p.sum(axis=-1, keepdims=True)
            acc_sc[h] = alpha * acc_sc[h] + lax.dot_general(
                p.astype(v.dtype), v, (((1,), (0,)), ((), ())),
                preferred_element_type=jnp.float32)
            m_sc[h] = m_new

    # Strictly-below-diagonal kv tiles: no mask / iotas needed.
    @pl.when(ki < qi)
    def _():
        update(masked=False)

    # Diagonal tile (last contributing kv step): mask, then finalize.
    # NOTE: pl.reciprocal(approx=True) introduces ~1e-3 relative error in the
    # normalization; switch to approx=False for training-grade numerics.
    @pl.when(ki == qi)
    def _():
        update(masked=True)
        for h in range(n_heads):
            inv_l = pl.reciprocal(l_sc[h], approx=True)
            o_ref[:, h * head_dim:(h + 1) * head_dim] = (
                acc_sc[h] * inv_l).astype(o_ref.dtype)
    # kv tiles with ki > qi: fully above the diagonal -> no compute, and the
    # clamped k/v index_maps mean no new DMA either.


def _flash_attention(qkv, *, n_heads, head_dim_p, block):
    """qkv: (B, Tp, 3*Dp) with columns [q | k | v], each per-head padded to
    head_dim_p.  Returns causal attention output (B, Tp, Dp)."""
    B, Tp, three_dp = qkv.shape
    Dp = n_heads * head_dim_p
    assert three_dp == 3 * Dp and Tp % block == 0
    n_blk = Tp // block
    cdt = qkv.dtype
    itm = jnp.dtype(cdt).itemsize

    kernel = functools.partial(_flash_attn_kernel, n_heads=n_heads,
                               head_dim=head_dim_p, block_q=block,
                               block_k=block)

    # double-buffered q/k/v + out blocks, f32 stats/acc, s/p temporaries
    vmem = (2 * 3 * block * Dp * itm
            + 2 * block * Dp * itm
            + n_heads * block * (head_dim_p + 2) * 4
            + 3 * block * block * 4)
    flops = 2 * B * n_heads * Tp * Tp * head_dim_p          # causal ~halved
    transc = B * n_heads * Tp * Tp // 2
    bytes_accessed = (B * Tp * Dp * itm                                 # q
                      + 2 * B * Tp * Dp * itm * (n_blk + 1) // 2        # k, v
                      + B * Tp * Dp * itm)                              # out

    return pl.pallas_call(
        kernel,
        out_shape=jax.ShapeDtypeStruct((B, Tp, Dp), cdt),
        grid_spec=pltpu.PrefetchScalarGridSpec(
            num_scalar_prefetch=0,
            grid=(B, n_blk, n_blk),
            in_specs=[
                # q: column block 0 of the fused qkv buffer
                pl.BlockSpec((None, block, Dp), lambda b, qi, ki: (b, qi, 0)),
                # k/v: column blocks 1/2; kv block index clamped to the
                # diagonal so causally-skipped steps reuse the previous DMA
                pl.BlockSpec((None, block, Dp),
                             lambda b, qi, ki: (b, jnp.minimum(ki, qi), 1)),
                pl.BlockSpec((None, block, Dp),
                             lambda b, qi, ki: (b, jnp.minimum(ki, qi), 2)),
            ],
            out_specs=pl.BlockSpec((None, block, Dp),
                                   lambda b, qi, ki: (b, qi, 0)),
            scratch_shapes=[
                pltpu.VMEM((n_heads, block, 1), jnp.float32),      # running max
                pltpu.VMEM((n_heads, block, 1), jnp.float32),      # running sum
                pltpu.VMEM((n_heads, block, head_dim_p), jnp.float32),  # acc
            ],
        ),
        compiler_params=pltpu.CompilerParams(
            dimension_semantics=("parallel", "parallel", "arbitrary"),
            vmem_limit_bytes=_vmem_limit(vmem),
        ),
        cost_estimate=pl.CostEstimate(flops=int(flops),
                                      transcendentals=int(transc),
                                      bytes_accessed=int(bytes_accessed)),
    )(qkv, qkv, qkv)


# ---------------------------------------------------------------------------
# one-time parameter preparation (pad / transpose / fold scale / bf16 cast)
# ---------------------------------------------------------------------------

def prepare_qkv_attention_params(w_qkv, b_qkv, w_o, b_o, n_heads,
                                 compute_dtype=jnp.bfloat16):
    """Weights in PyTorch nn.Linear layout: w_qkv (3D, D), b_qkv (3D,),
    w_o (D, D), b_o (D,).  Returns prepped, padded, bf16 kernel weights."""
    three_d, D = w_qkv.shape
    assert three_d == 3 * D and D % n_heads == 0
    H = n_heads
    hd = D // H
    g = math.gcd(H, 128)
    hd_p = _round_up(hd, max(128 // g, 1))   # H * hd_p is a multiple of 128
    Dp = H * hd_p
    scale = 1.0 / math.sqrt(hd)              # softmax scale, folded into q

    f32 = jnp.float32
    w_qkv = w_qkv.astype(f32)
    b_qkv = b_qkv.astype(f32)
    w_o = w_o.astype(f32)
    b_o = b_o.astype(f32)

    wq, wk, wv = w_qkv[:D] * scale, w_qkv[D:2 * D], w_qkv[2 * D:]
    bq, bk, bv = b_qkv[:D] * scale, b_qkv[D:2 * D], b_qkv[2 * D:]

    def proj_t_padded(w):   # (D_out=D, D_in=D) torch layout -> (Dp, Dp)
        wt = _pad_heads_last(w.T, H, hd, hd_p)        # out cols per-head padded
        return jnp.pad(wt, ((0, Dp - D), (0, 0)))     # in rows end-padded

    wqkv_t = jnp.concatenate(
        [proj_t_padded(wq), proj_t_padded(wk), proj_t_padded(wv)], axis=1)
    bqkv = jnp.concatenate(
        [_pad_heads_last(b, H, hd, hd_p) for b in (bq, bk, bv)]
    ).reshape(1, 3 * Dp)

    wo_t = _pad_heads_last(w_o, H, hd, hd_p).T        # attn-feature rows padded
    wo_t = jnp.pad(wo_t, ((0, 0), (0, Dp - D)))       # (Dp, Dp)
    bo = jnp.pad(b_o, (0, Dp - D)).reshape(1, Dp)

    return dict(
        wqkv_t=wqkv_t.astype(compute_dtype),   # (Dp, 3*Dp)
        bqkv=bqkv,                             # (1, 3*Dp) f32
        wo_t=wo_t.astype(compute_dtype),       # (Dp, Dp)
        bo=bo,                                 # (1, Dp) f32
        n_heads=H, head_dim=hd, head_dim_p=hd_p, model_dims=D, Dp=Dp,
        compute_dtype=compute_dtype,
    )


# ---------------------------------------------------------------------------
# QKVAttention forward (cache=None, causal)
# ---------------------------------------------------------------------------

def qkv_attention(x, params):
    """x: (B, T, D).  params from prepare_qkv_attention_params."""
    B, T, D = x.shape
    assert D == params["model_dims"]
    H = params["n_heads"]
    hd_p = params["head_dim_p"]
    Dp = params["Dp"]
    cdt = params["compute_dtype"]

    blk = _attn_block_target()
    if T <= blk:
        Tp = _round_up(T, 8)
        block = Tp
    else:
        Tp = _round_up(T, blk)
        block = blk

    # pad activations once, directly in the compute dtype (no f32 round trip)
    x_p = jnp.pad(x.astype(cdt), ((0, 0), (0, Tp - T), (0, Dp - D)))

    # 1) fused qkv projection -> (B*Tp, 3*Dp), q|k|v contiguous column groups
    qkv = _linear(x_p.reshape(B * Tp, Dp), params["wqkv_t"], params["bqkv"],
                  out_dtype=cdt)
    qkv = qkv.reshape(B, Tp, 3 * Dp)

    # 2) causal flash attention reading q/k/v straight from the fused buffer
    #    (no XLA transposes) and writing a lane-dense (B, Tp, Dp) output
    attn = _flash_attention(qkv, n_heads=H, head_dim_p=hd_p, block=block)

    # 3) output projection (free reshape into the GEMM layout)
    out = _linear(attn.reshape(B * Tp, Dp), params["wo_t"], params["bo"],
                  out_dtype=x.dtype)
    return out.reshape(B, Tp, Dp)[:, :T, :D]


# ---------------------------------------------------------------------------
# pure-JAX reference (mirrors the PyTorch forward, cache=None)
# ---------------------------------------------------------------------------

def _reference(x, w_qkv, b_qkv, w_o, b_o, n_heads):
    B, T, D = x.shape
    d = D // n_heads
    qkv = x @ w_qkv.T + b_qkv
    q, k, v = jnp.split(qkv, 3, axis=-1)
    reshape = lambda t: t.reshape(B, T, n_heads, d).transpose(0, 2, 1, 3)
    q, k, v = reshape(q), reshape(k), reshape(v)
    s = jnp.einsum("bhtd,bhsd->bhts", q, k) / math.sqrt(d)
    mask = jnp.tril(jnp.ones((T, T), dtype=bool))
    s = jnp.where(mask, s, -jnp.inf)
    p = jax.nn.softmax(s, axis=-1)
    o = jnp.einsum("bhts,bhsd->bhtd", p, v)
    o = o.transpose(0, 2, 1, 3).reshape(B, T, D)
    return o @ w_o.T + b_o


if __name__ == "__main__":
    # Small shapes consistent with the module: batch=2, seq=8, model_dims=32, 4 heads.
    B, T, D, H = 2, 8, 32, 4

    key = jax.random.PRNGKey(0)
    kx, kwq, kbq, kwo, kbo, kx2 = jax.random.split(key, 6)

    x = jax.random.normal(kx, (B, T, D), dtype=jnp.float32)
    w_qkv = jax.random.normal(kwq, (3 * D, D), dtype=jnp.float32) * 0.05
    b_qkv = jax.random.normal(kbq, (3 * D,), dtype=jnp.float32) * 0.05
    w_o = jax.random.normal(kwo, (D, D), dtype=jnp.float32) * 0.05
    b_o = jax.random.normal(kbo, (D,), dtype=jnp.float32) * 0.05

    # one-time weight prep (pad / transpose / fold softmax scale / bf16 cast)
    params = prepare_qkv_attention_params(w_qkv, b_qkv, w_o, b_o, n_heads=H)

    # --- check 1: tiny shape (single-tile diagonal path) ---
    out = jax.block_until_ready(qkv_attention(x, params))
    ref = _reference(x, w_qkv, b_qkv, w_o, b_o, H)
    assert out.shape == (B, T, D)
    assert bool(jnp.all(jnp.isfinite(out)))
    err = float(jnp.max(jnp.abs(out - ref)))
    assert jnp.allclose(out, ref, atol=3e-2, rtol=3e-2), f"mismatch (max err {err})"

    # --- check 2: longer sequence exercising multi-tile flash path,
    #     interior/diagonal split, K/V DMA clamping and seq/head padding ---
    T2 = 300
    x2 = jax.random.normal(kx2, (B, T2, D), dtype=jnp.float32)
    out2 = jax.block_until_ready(qkv_attention(x2, params))
    ref2 = _reference(x2, w_qkv, b_qkv, w_o, b_o, H)
    assert out2.shape == (B, T2, D)
    assert bool(jnp.all(jnp.isfinite(out2)))
    err2 = float(jnp.max(jnp.abs(out2 - ref2)))
    assert jnp.allclose(out2, ref2, atol=3e-2, rtol=3e-2), f"mismatch (max err {err2})"

    print("KERNEL_OK")
</pallas_src>

<mosaic_0001>
module attributes {stable_mosaic.version = 11 : i64} {
  func.func @_linear_kernel(%arg0: i32, %arg1: i32, %arg2: i32, %arg3: memref<16x128xbf16, #tpu.memory_space<vmem>>, %arg4: memref<128x128xbf16, #tpu.memory_space<vmem>>, %arg5: memref<1x128xf32, #tpu.memory_space<vmem>>, %arg6: memref<16x128xbf16, #tpu.memory_space<vmem>>, %arg7: memref<16x128xf32, #tpu.memory_space<vmem>>) attributes {dimension_semantics = [#tpu.dimension_semantics<parallel>, #tpu.dimension_semantics<parallel>, #tpu.dimension_semantics<arbitrary>], iteration_bounds = array<i64: 1, 3, 1>, scalar_prefetch = 0 : i64, scratch_operands = 1 : i64, tpu.core_type = #tpu.core_type<tc>, window_params = [{transform_indices = @transform_0, window_bounds = array<i64: 16, 128>}, {transform_indices = @transform_1, window_bounds = array<i64: 128, 128>}, {transform_indices = @transform_2, window_bounds = array<i64: 1, 128>}, {transform_indices = @transform_3, window_bounds = array<i64: 16, 128>}]} {
    %c0_i32 = arith.constant 0 : i32
    %0 = arith.cmpi eq, %arg2, %c0_i32 : i32
    %1 = arith.extui %0 : i1 to i32
    %c0_i32_0 = arith.constant 0 : i32
    %2 = arith.cmpi ne, %1, %c0_i32_0 : i32
    scf.if %2 {
      %cst_10 = arith.constant 0.000000e+00 : f32
      %12 = vector.broadcast %cst_10 : f32 to vector<16x128xf32>
      %c0_11 = arith.constant 0 : index
      %c0_12 = arith.constant 0 : index
      %13 = vector.load %arg7[%c0_11, %c0_12] : memref<16x128xf32, #tpu.memory_space<vmem>>, vector<16x128xf32>
      tpu.vector_store %arg7[%c0_11, %c0_12], %12 {strides = array<i32>} : memref<16x128xf32, #tpu.memory_space<vmem>>, vector<16x128xf32>,
    } else {
    }
    %c0 = arith.constant 0 : index
    %c0_1 = arith.constant 0 : index
    %3 = vector.load %arg7[%c0, %c0_1] : memref<16x128xf32, #tpu.memory_space<vmem>>, vector<16x128xf32>
    %c0_2 = arith.constant 0 : index
    %c0_3 = arith.constant 0 : index
    %4 = vector.load %arg3[%c0_2, %c0_3] : memref<16x128xbf16, #tpu.memory_space<vmem>>, vector<16x128xbf16>
    %c0_4 = arith.constant 0 : index
    %c0_5 = arith.constant 0 : index
    %5 = vector.load %arg4[%c0_4, %c0_5] : memref<128x128xbf16, #tpu.memory_space<vmem>>, vector<128x128xbf16>
    %cst = arith.constant dense<0.000000e+00> : vector<16x128xf32>
    %6 = tpu.matmul %4, %5, %cst {dimension_numbers = #tpu.dot_dimension_numbers<[1], [0], [0], [1], [0, 0, 1, 1], [], []>} : vector<16x128xbf16>, vector<128x128xbf16>, vector<16x128xf32> -> vector<16x128xf32>
    %7 = arith.addf %3, %6 : vector<16x128xf32>
    %c0_6 = arith.constant 0 : index
    %c0_7 = arith.constant 0 : index
    %8 = vector.load %arg7[%c0_6, %c0_7] : memref<16x128xf32, #tpu.memory_space<vmem>>, vector<16x128xf32>
    tpu.vector_store %arg7[%c0_6, %c0_7], %7 {strides = array<i32>} : memref<16x128xf32, #tpu.memory_space<vmem>>, vector<16x128xf32>,
    %c0_i32_8 = arith.constant 0 : i32
    %9 = arith.cmpi eq, %arg2, %c0_i32_8 : i32
    %10 = arith.extui %9 : i1 to i32
    %c0_i32_9 = arith.constant 0 : i32
    %11 = arith.cmpi ne, %10, %c0_i32_9 : i32
    scf.if %11 {
      %c0_10 = arith.constant 0 : index
      %c0_11 = arith.constant 0 : index
      %12 = vector.load %arg7[%c0_10, %c0_11] : memref<16x128xf32, #tpu.memory_space<vmem>>, vector<16x128xf32>
      %c0_12 = arith.constant 0 : index
      %c0_13 = arith.constant 0 : index
      %13 = vector.load %arg5[%c0_12, %c0_13] : memref<1x128xf32, #tpu.memory_space<vmem>>, vector<1x128xf32>
      %14 = vector.broadcast %13 : vector<1x128xf32> to vector<16x128xf32>
      %15 = arith.addf %12, %14 : vector<16x128xf32>
      %16 = arith.truncf %15 : vector<16x128xf32> to vector<16x128xbf16>
      %c0_14 = arith.constant 0 : index
      %c0_15 = arith.constant 0 : index
      %17 = vector.load %arg6[%c0_14, %c0_15] : memref<16x128xbf16, #tpu.memory_space<vmem>>, vector<16x128xbf16>
      tpu.vector_store %arg6[%c0_14, %c0_15], %16 {strides = array<i32>} : memref<16x128xbf16, #tpu.memory_space<vmem>>, vector<16x128xbf16>,
    } else {
    }
    return
  }
  func.func @transform_0(%arg0: i32, %arg1: i32, %arg2: i32) -> (i32, i32) {
    %c0_i32 = arith.constant 0 : i32
    return %arg0, %arg2 : i32, i32
  }
  func.func @transform_1(%arg0: i32, %arg1: i32, %arg2: i32) -> (i32, i32) {
    %c0_i32 = arith.constant 0 : i32
    return %arg2, %arg1 : i32, i32
  }
  func.func @transform_2(%arg0: i32, %arg1: i32, %arg2: i32) -> (i32, i32) {
    %c0_i32 = arith.constant 0 : i32
    %c0_i32_0 = arith.constant 0 : i32
    return %c0_i32, %arg1 : i32, i32
  }
  func.func @transform_3(%arg0: i32, %arg1: i32, %arg2: i32) -> (i32, i32) {
    %c0_i32 = arith.constant 0 : i32
    return %arg0, %arg1 : i32, i32
  }
}

</mosaic_0001>

<bundles_post_ra>
// kernel: tpu_custom_call.1
= control target key start
LH: loop header
LB: loop body
LE: loop exit
PB: predicated region body
PF: predicated region fallthrough
CT: control target
= control target key end

     0   :  { %8 = vsyncpa [#allocation4], 0  ;;  %s1044_s0 = inlined_call_operand.hbm [shape: bf16[16,128], index: 0, kind: input, shape index: {}]   ;;  %s1045_s1 = inlined_call_operand.hbm [shape: bf16[128,384], index: 1, kind: input, shape index: {}]   ;;  %s1046_s2 = inlined_call_operand.vmem [shape: f32[1,384], index: 2, kind: input, shape index: {}]   ;;  %s1047_s3 = inlined_call_operand.hbm [shape: bf16[16,384], index: 3, kind: output, shape index: {}]  }
   0x1   :  { %9 = vsyncpa [#allocation7], 0 }
   0x2   :  { %11 = vsyncpa [#allocation7 + $0x1], 0 }
   0x3   :  { %12 = vsyncpa [#allocation5], 0 }
   0x4   :  { %14 = vsyncpa [#allocation5 + $0x1], 0  ;;  %s860_s12 = smov 0   ;;  %s862_s13 = smov 0  }
   0x5   :  { %s864_s14 = smov 0   ;;  %s866_s15 = smov 0  }
   0x6   :  { %s868_s16 = smov 0   ;;  %s870_s17 = smov 0  }
   0x7 LB: > { %1053 = sst [smem:[#allocation12_spill]] %s807_s12  ;;  %s536_s18 = sadd.s32 4294967295, %s827_s17   ;;  %s827_s17 = sphi %s870_s17, %s20_s17   ;;  %s823_s16 = sphi %s868_s16, %s1074_s16   ;;  %s819_s15 = sphi %s866_s15, %s1073_s15   ;;  %s815_s14 = sphi %s864_s14, %s1072_s14   ;;  %s811_s13 = sphi %s862_s13, %s1071_s13   ;;  %s807_s12 = sphi %s860_s12, %s1070_s12  }
   0x8   : > { %s537_s19 = sadd.s32 4294967294, %s827_s17   ;;  %p83_p0 = scmp.ne.s32.totalorder %s815_s14, %s811_s13 }
   0x9   : > { %p84_p1 = scmp.eq.s32.totalorder %s827_s17, 0  ;;  %p89_p2 = scmp.ne.s32.totalorder %s811_s13, %s807_s12 }
   0xa   : > { %p897_p3 = scmp.eq.s32.totalorder %s536_s18, 0  ;;  %p141_p5 = scmp.eq.s32.totalorder %s536_s18, 2 }
   0xb   : > { %p901_p4 = por %p84_p1, %p83_p0  ;;  %p147_p7 = scmp.eq.s32.totalorder %s537_s19, 2 }
   0xc   : > { %p907_p6 = por %p897_p3, %p89_p2  ;;  %p911_p8 = por %p141_p5, %p83_p0 }
   0xd   : > { %p538_p9 = scmp.ge.s32.totalorder %s827_s17, 1  ;;  %p916_p10 = por %p147_p7, %p89_p2 }
   0xe   : > { %s1056_s22 = scalar_select %p907_p6, 1, 0 }
   0xf   : > { %s1057_s23 = scalar_select %p911_p8, 1, 0 }
  0x10   : > { %s1058_s24 = scalar_select %p916_p10, 1, 0 }
  0x11   : > { %p154_p11 = scmp.lt.s32.totalorder %s827_s17, 4  ;;  %s829_s26 = smov [#allocation3]  }
  0x12   : > { %1059 = sst [smem:[#allocation13_spill]] %s1058_s24  ;;  %s170_s27 = sshll.u32 %s829_s26, 4  ;;  %s171_s27 = int_to_ptr.vmem [resolvable:$true] %s170_s27 }
  0x13   : > { %p921_p12 = pnand %p538_p9, %p154_p11  ;;  %p620_p0 = scmp.lt.s32.totalorder %s827_s17, 3 }
  0x14   : > { %s35_s30 = sadd.s32 1, %s823_s16  ;;  %s700_s4 = scalar_lea.vmem %s171_s27, 128 }
  0x15   : > { %p607_p13 = pneg %p921_p12  ;;  %p936_p2 = pnand %p620_p0, %p901_p4 }
  0x16   : > { %p701_p7 = scmp.ne.s32.totalorder %s171_s27, %s700_s4  ;;  %p708_p10 = scmp.lt.s32.totalorder %s171_s27, %s171_s27 }
  0x17   : > { %p930_p1 = pnand %p607_p13, %p897_p3  ;;  %p709_p8 = scmp.lt.s32.totalorder %s700_s4, %s700_s4 }
  0x19   : > { %p691_p5 = pneg %p930_p1  ;;  %p710_p6 = por %p709_p8, %p708_p10 }
  0x1b   : > { %p703_p9 = pnand %p701_p7, %p691_p5 }
  0x1d   : > { %p704_p11 = pneg %p703_p9 }
  0x1f   : > { %p711_p13 = pnand %p710_p6, %p704_p11 }
  0x21   : > { %714 = shalt.err (!%p711_p13)
}
  0x22   : > { %s1052_s5 = smov 64   ;;  %s831_s6 = smov 4  }
  0x23   : > { %610 = dma.hbm_to_vmem [thread:$0]  (!%p930_p1), %s1044_s0, 128, %s171_s27, [#allocation4], %s1052_s5, %s1052_s5, %s831_s6  }
  0x24   : > { %p37_p4 = scmp.ge.s32.totalorder %s35_s30, 3  ;;  %s76_s9 = sadd.s32 1, %s815_s14 }
  0x25   : > { %s184_s10 = sand.u32 1, %s815_s14   ;;  %s542_s19 = sshll.u32 %s823_s16, 6 }
  0x26   : > { %s1076_s30 = smov (%p37_p4, %s35_s30), 0  ;;  %s541_s11 = sshll.u32 %s184_s10, 6 }
  0x27   : > { %s72_s18 = ssub.s32 %s823_s16, %s1076_s30  ;;  %s196_s28 = scalar_lea.hbm %s1045_s1, %s542_s19 }
  0x28   : > { %p74_p6 = scmp.eq.s32.totalorder %s72_s18, 0  ;;  %s188_s4 = scalar_lea.vmem [#allocation6], %s541_s11 }
  0x29   : > { %s197_s24 = sshll.u32 %s188_s4, 4  ;;  %s185_s27 = scalar_lea.sflag [#allocation7], %s184_s10  ;;  %s198_s24 = int_to_ptr.vmem [resolvable:$true] %s197_s24 }
  0x2a   : > { %s962_s12 = scalar_select %p74_p6, %s815_s14, %s76_s9  }
  0x2b   : > { %p717_p8 = pneg %p936_p2  ;;  %s728_s7 = scalar_lea.vmem %s198_s24, 1024 }
  0x2c   : > { %p729_p10 = scmp.ne.s32.totalorder %s198_s24, %s728_s7  ;;  %s832_s8 = smov [#allocation6]  }
  0x2d   : > { %s733_s5 = sshll.u32 %s832_s8, 4  ;;  %s734_s5 = int_to_ptr.vmem [resolvable:$false] %s733_s5 }
  0x2e   : > { %p731_p0 = pnand %p729_p10, %p717_p8  ;;  %s735_s18 = scalar_lea.vmem %s734_s5, 2048 }
  0x2f   : > { %p736_p5 = scmp.lt.s32.totalorder %s198_s24, %s734_s5  ;;  %p737_p7 = scmp.lt.s32.totalorder %s735_s18, %s728_s7 }
  0x30   : > { %p732_p1 = pneg %p731_p0 }
  0x31   : > { %p738_p9 = por %p737_p7, %p736_p5 }
  0x33   : > { %p739_p11 = pnand %p738_p9, %p732_p1 }
  0x35   : > { %742 = shalt.err (!%p739_p11)
}
  0x36   : > { %s833_s11 = smov 192   ;;  %s1063_s9 = smov 64  }
  0x37   : > { %614 = dma.hbm_to_vmem [thread:$0]  (!%p936_p2), %s196_s28, 1024, %s198_s24, %s185_s27, %s833_s11, %s1063_s9, %s831_s6  }
  0x38   : > { %215 = sbr.rel (%p921_p12) target bundleno = 315 (0x13b), region = 32 }
  0x3d   : > { %794 = dma.done.wait (%p897_p3), [#allocation4], 128  }
  0x3e   : > { %796 = vsyncadd (%p897_p3), [#allocation4], 4294967168  ;;  %s977_s5 = sand.u32 1, %s811_s13   ;;  %p1064_p13 = scmp.ne.s32.totalorder %s1056_s22, 0 }
  0x3f   : > { %s545_s10 = sshll.u32 %s977_s5, 6  ;;  %s222_s29 = scalar_lea.sflag [#allocation7], %s977_s5 }
  0x40   : > { %s225_s19 = scalar_lea.vmem [#allocation6], %s545_s10 }
  0x41   : > { %798 = dma.done.wait (%p1064_p13), %s222_s29, 1024  }
  0x42   : > { %800 = vsyncadd (%p1064_p13), %s222_s29, 4294966272  ;;  %v834_v0 = vmov 0.0   ;;  %vm835_vm0 = vmmov 0   ;;  %v680_v1 = vld [vmem:[%s225_s19 + $0x38] sm:$0xff]   ;;  %v681_v2 = vld [vmem:[%s225_s19 + $0x30] sm:$0xff]   ;;  %p253_p3 = scmp.lt.s32.totalorder %s819_s15, 2 }
  0x43   : > { %579 = vmatprep.subr.bf16.mxu0 %v834_v0  ;;  %595 = vmatprep.mubr.msk.bf16.mxu0 %vm835_vm0, %v834_v0  ;;  %v682_v3 = vld [vmem:[%s225_s19 + $0x28] sm:$0xff]   ;;  %v683_v4 = vld [vmem:[%s225_s19 + $0x20] sm:$0xff]   ;;  %v684_v5 = vld [vmem:[%s225_s19 + $0x18] sm:$0xff]   ;;  %s546_s22 = sshll.u32 %s977_s5, 3  ;;  %s560_s28 = sshll.u32 %s819_s15, 6 }
  0x44   : > { %580 = vmatpush3.bf16.msra.mxu0 %v680_v1  ;;  %v685_v6 = vld [vmem:[%s225_s19 + $0x10] sm:$0xff]   ;;  %v686_v7 = vld [vmem:[%s225_s19 + $0x8] sm:$0xff]   ;;  %v687_v8 = vld [vmem:[%s225_s19] sm:$0xff]   ;;  %s254_s20 = scalar_select %p253_p3, %s819_s15, 2 }
  0x45   : > { %581 = vmatprep.subr.bf16.mxu0 %v834_v0  ;;  %v688_v9 = vld [vmem:[#allocation3] sm:$0xff]   ;;  %s250_s21 = scalar_lea.vmem [#allocation8], %s546_s22  ;;  %s997_s7 = scalar_lea.hbm %s1047_s3, %s560_s28 }
  0x46   : > { %s255_s6 = scalar_lea.vmem %s1046_s2, %s254_s20  ;;  %s423_s26 = sshll.u32 %s250_s21, 4  ;;  %s992_s26 = int_to_ptr.vmem [resolvable:$true] %s423_s26 }
  0x47   : > { %v556_v11 = vld [vmem:[%s255_s6] ss:$0 sm:$0xff]  ;;  %s408_s8 = scalar_lea.sflag [#allocation5], %s977_s5  ;;  %s743_s18 = scalar_lea.vmem %s992_s26, 128 }
  0x48   : > { %582 = vmatpush3.bf16.msra.mxu0 %v681_v2  ;;  %p744_p12 = scmp.ne.s32.totalorder %s992_s26, %s743_s18  ;;  %p1065_p2 = scmp.ne.s32.totalorder %s1057_s23, 0 }
  0x49   : > { %583 = vmatprep.subr.bf16.mxu0 %v834_v0  ;;  %s836_s15 = smov [#allocation8]  }
  0x4a   : > { %p745_p4 = pnand %p744_p12, %p1065_p2  ;;  %s747_s11 = sshll.u32 %s836_s15, 4  ;;  %s748_s11 = int_to_ptr.vmem [resolvable:$false] %s747_s11 }
  0x4b   : > { %s749_s9 = scalar_lea.vmem %s748_s11, 256  ;;  %p750_p8 = scmp.lt.s32.totalorder %s992_s26, %s748_s11 }
  0x4c   : > { %584 = vmatpush3.bf16.msra.mxu0 %v682_v3  ;;  %p746_p6 = pneg %p745_p4  ;;  %p751_p10 = scmp.lt.s32.totalorder %s749_s9, %s743_s18 }
  0x4d   : > { %585 = vmatprep.subr.bf16.mxu0 %v834_v0 }
  0x4e   : > { %p752_p0 = por %p751_p10, %p750_p8 }
  0x50   : > { %586 = vmatpush3.bf16.msra.mxu0 %v683_v4  ;;  %p753_p1 = pnand %p752_p0, %p746_p6 }
  0x51   : > { %587 = vmatprep.subr.bf16.mxu0 %v834_v0 }
  0x54   : > { %588 = vmatpush3.bf16.msra.mxu0 %v684_v5 }
  0x55   : > { %589 = vmatprep.subr.bf16.mxu0 %v834_v0 }
  0x58   : > { %590 = vmatpush3.bf16.msra.mxu0 %v685_v6 }
  0x59   : > { %591 = vmatprep.subr.bf16.mxu0 %v834_v0 }
  0x5c   : > { %592 = vmatpush3.bf16.msra.mxu0 %v686_v7 }
  0x5d   : > { %593 = vmatprep.subr.bf16.mxu0 %v834_v0 }
  0x60   : > { %594 = vmatpush3.bf16.msra.mxu0 %v687_v8 }
  0x63   : > { %596 = vmatmul.mubr.bf16.vlgmr.msra.gmra.mxu0 %v688_v9 }
 0x123   : > { %v372_v10 = vpop.f32.mrf.mxu0 }
 0x124   : > { %v395_v14 = vadd.f32 %v556_v11, %v372_v10 }
 0x125   : > { %v597_v12 = vpop.f32.mrf.mxu0 }
 0x127   : > { %v375_v13 = vpop.f32.mrf.mxu0 }
 0x128   : > { %v396_v15 = vadd.f32 %v556_v11, %v375_v13 }
 0x129   : > { %v598_v16 = vpop.f32.mrf.mxu0 }
 0x12a   : > { %v568_v17 = vpack.c.bf16 %v396_v15, %v395_v14 }
 0x12c   : > { %569 = vst [vmem:[%s250_s21] sm:$0xff] %v568_v17  }
 0x12d   : > { %756 = shalt.err (!%p753_p1)
}
 0x12e   : > { %s757_s10 = scalar_lea.hbm %s997_s7, 128  ;;  %s761_s20 = scalar_lea.hbm %s1047_s3, 384 }
 0x12f   : > { %p758_p5 = scmp.ne.s32.totalorder %s997_s7, %s757_s10  ;;  %p762_p11 = scmp.lt.s32.totalorder %s997_s7, %s1047_s3 }
 0x130   : > { %p763_p13 = scmp.lt.s32.totalorder %s761_s20, %s757_s10 }
 0x131   : > { %p759_p7 = pnand %p758_p5, %p1065_p2 }
 0x132   : > { %p764_p3 = por %p763_p13, %p762_p11 }
 0x133   : > { %p760_p9 = pneg %p759_p7 }
 0x135   : > { %p765_p12 = pnand %p764_p3, %p760_p9 }
 0x137   : > { %768 = shalt.err (!%p765_p12)
}
 0x138   : > { %s837_s25 = smov 64   ;;  %s838_s6 = smov 192  }
 0x139   : > { %s839_s21 = smov 4  }
 0x13a   : > { %605 = dma.vmem_to_hbm [thread:$0]  (%p1065_p2), %s992_s26, 128, %s997_s7, %s408_s8, %s837_s25, %s838_s6, %s839_s21  }
 0x13b PF: > { %s1066_s28 = sld [smem:[#allocation12_spill]]  ;;  %p622_p4 = scmp.ge.s32.totalorder %s827_s17, 2 }
 0x13c   : > { %s1067_s4 = sld [smem:[#allocation13_spill]] }
 0x141   : > { %s438_s27 = sand.u32 1, %s1066_s28  }
 0x142   : > { %p1068_p6 = scmp.ne.s32.totalorder %s1067_s4, 0  ;;  %s439_s18 = scalar_lea.sflag [#allocation5], %s438_s27 }
 0x144   : > { %p616_p8 = pnand %p622_p4, %p1068_p6 }
 0x146   : > { %p617_p10 = pneg %p616_p8 }
 0x148   : > { %802 = dma.done.wait (%p617_p10), %s439_s18, 128  }
 0x149   : > { %804 = vsyncadd (%p617_p10), %s439_s18, 4294967168  ;;  %s20_s17 = sadd.s32 1, %s827_s17   ;;  %s1069_s23 = smov %s962_s12 }
 0x14a   : > { %p17_p0 = scmp.ge.s32.totalorder %s20_s17, 5   ;;  %s1070_s12 = smov %s811_s13 }
 0x14b   : > { %s1071_s13 = smov %s815_s14  ;;  %s1072_s14 = smov %s1069_s23 }
 0x14c   : > { %s1073_s15 = smov %s823_s16  ;;  %s1074_s16 = smov %s1076_s30 }
 0x14d   :  { %19 = sbr.rel (!%p17_p0) target bundleno = 7 (0x7), region = 94 }
 0x152   :  { %444 = vsyncpa [#allocation4], 1 }
 0x153   :  { %446 = vsyncpa [#allocation4 + $0x1], 1 }
 0x154   :  { %447 = vsyncpa [#allocation7], 1 }
 0x155   :  { %449 = vsyncpa [#allocation7 + $0x1], 1 }
 0x156   :  { %450 = vsyncpa [#allocation5], 1 }
 0x157   :  { %452 = vsyncpa [#allocation5 + $0x1], 1 }

</bundles_post_ra>
